<compile_context>
chip_gen: v5e
topology: v5e:2x2
jax: 0.10.0
libtpu: 0.0.40
codegen_flags: <defaults>
</compile_context>

<pallas_src>
import functools

import jax
import jax.numpy as jnp
from jax import lax
from jax.experimental import pallas as pl
from jax.experimental.pallas import tpu as pltpu

N = 16        # max_nodes
RANK = 8      # rank
ALPHA = 0.5
BETA = 0.5


def _vmem():
    return pl.BlockSpec(memory_space=pltpu.MemorySpace.VMEM)


def _smem():
    return pl.BlockSpec(memory_space=pltpu.MemorySpace.SMEM)


# ---------------------------------------------------------------------------
# Fully-fused training path: init + the entire `while diff > 0` multiplicative
# update loop, all inside one pallas_call.
# ---------------------------------------------------------------------------
def _accslp_fused_kernel(n, rank, alpha, beta,
                         s_ref, x_ref, z_ref,   # inputs  (VMEM)
                         o_ref):                # output  (SMEM, (1, 1))
    f32 = jnp.float32
    S = s_ref[...]
    X = x_ref[...]
    Z = z_ref[...]

    def objective(S_pred, X_pred, Z_pred):
        # One fused element-wise expression + a single XLU reduction.
        obj = ((S_pred - S * jnp.log(S_pred))
               + alpha * (X_pred - X * jnp.log(X_pred))
               + beta * (Z_pred - Z * jnp.log(Z_pred)))
        return jnp.sum(obj)

    # --- init: U = H = W = V = ones  =>  every initial prediction == rank.
    U0 = jnp.ones((n, rank), f32)
    W0 = jnp.ones((n, rank), f32)
    H0 = jnp.ones((rank, n), f32)
    V0 = jnp.ones((rank, n), f32)
    pred0 = jnp.full((n, n), float(rank), dtype=f32)
    diff0 = objective(pred0, pred0, pred0)
    S_div0 = S / pred0
    X_div0 = X / pred0
    Z_div0 = Z / pred0

    def cond(carry):
        return carry[0] > 0.0

    def body(carry):
        diff, _, U, H, W, V, S_div, X_div, Z_div = carry

        # ---- U update ----------------------------------------------------
        # U_coeff[l,k] = sum_j (S_div[l,j]*H[k,j] + b*Z_div[l,j]*V[k,j])
        #                        / (H[k,j] + b*V[k,j])
        inv_hv = pl.reciprocal(H + beta * V)                        # (r, n)
        u_coeff = (
            lax.dot_general(S_div, H * inv_hv, (((1,), (1,)), ((), ())),
                            preferred_element_type=f32)
            + beta * lax.dot_general(Z_div, V * inv_hv, (((1,), (1,)), ((), ())),
                                     preferred_element_type=f32))   # (n, r)
        U = U * u_coeff
        S_pred = jnp.dot(U, H, preferred_element_type=f32)          # (n, n)
        Z_pred = jnp.dot(U, V, preferred_element_type=f32)          # (n, n)
        S_div = S / S_pred
        Z_div = Z / Z_pred

        # ---- H update ----------------------------------------------------
        # H_coeff[k,j] = sum_l (S_div[l,j]*U[l,k] + a*X_div[l,j]*W[l,k])
        #                        / (U[l,k] + a*W[l,k])
        # Fused into ONE MXU contraction over a 2n-long sublane-stacked axis.
        inv_uw = pl.reciprocal(U + alpha * W)                       # (n, r)
        lhs = jnp.concatenate([U * inv_uw, alpha * (W * inv_uw)], axis=0)  # (2n, r)
        rhs = jnp.concatenate([S_div, X_div], axis=0)                      # (2n, n)
        h_coeff = lax.dot_general(lhs, rhs, (((0,), (0,)), ((), ())),
                                  preferred_element_type=f32)       # (r, n)
        H = H * h_coeff

        # S_pred = U @ H and X_pred = W @ H share H: one matmul on [U; W].
        sx = jnp.dot(jnp.concatenate([U, W], axis=0), H,
                     preferred_element_type=f32)                    # (2n, n)
        S_pred = sx[:n, :]
        X_pred = sx[n:, :]
        S_div = S / S_pred
        X_div = X / X_pred

        # ---- W update ----------------------------------------------------
        # W_coeff[l,k] = sum_j X_div[l,j] * H[k,j]/H[k,j]  ==  row-sum (XLU).
        w_coeff = jnp.sum(X_div, axis=1, keepdims=True)             # (n, 1)
        W = W * w_coeff
        # X_pred_new = (w_coeff * W_old) @ H == w_coeff * (W_old @ H): reuse sx.
        X_pred = w_coeff * X_pred
        X_div = X / X_pred

        # ---- V update ----------------------------------------------------
        # V_coeff[k,j] = sum_l Z_div[l,j] * U[l,k]/U[l,k]  ==  col-sum (XLU).
        v_coeff = jnp.sum(Z_div, axis=0, keepdims=True)             # (1, n)
        V = V * v_coeff
        # Z_pred_new = U @ (V_old * v_coeff) == (U @ V_old) * v_coeff: reuse.
        Z_pred = v_coeff * Z_pred
        Z_div = Z / Z_pred

        # ---- objective after this sweep (same preds the PyTorch code uses)
        O = objective(S_pred, X_pred, Z_pred)
        return (diff - O, O, U, H, W, V, S_div, X_div, Z_div)

    init = (diff0, jnp.zeros((), f32), U0, H0, W0, V0, S_div0, X_div0, Z_div0)
    final = lax.while_loop(cond, body, init)

    # PyTorch leaves O undefined if the loop body never runs; emit 0.0 there
    # so the output is always written.  Single SMEM store, after the loop.
    o_ref[0, 0] = final[1]


# ---------------------------------------------------------------------------
# Wrappers
# ---------------------------------------------------------------------------
def accslp_forward(S, X, Z, alpha=ALPHA, beta=BETA, rank=RANK):
    """Training path of ACCSLP.forward; returns the final objective O."""
    n = S.shape[0]
    fused = pl.pallas_call(
        functools.partial(_accslp_fused_kernel, n, rank, alpha, beta),
        out_shape=jax.ShapeDtypeStruct((1, 1), jnp.float32),
        in_specs=[_vmem(), _vmem(), _vmem()],
        out_specs=_smem(),
    )
    return fused(S, X, Z)[0, 0]


def accslp_inference(n=N, rank=RANK):
    """Inference path: U @ H with the module's ones-initialised factors.

    ones(n, rank) @ ones(rank, n) == rank everywhere, so the result is a
    compile-time constant (no kernel launch / MXU matmul needed).
    """
    return jnp.full((n, n), float(rank), dtype=jnp.float32)


if __name__ == "__main__":
    key = jax.random.PRNGKey(0)
    k1, k2, k3 = jax.random.split(key, 3)
    # data['adj'].to_dense(): dense 0/1 adjacency
    S = jax.random.bernoulli(k1, 0.3, (N, N)).astype(jnp.float32)
    # data['community_membership'] / data['attribute_matrix']: strictly
    # positive (the model divides by / takes logs of their reconstructions).
    X = jax.random.uniform(k2, (N, N), jnp.float32, minval=0.1, maxval=1.1)
    Z = jax.random.uniform(k3, (N, N), jnp.float32, minval=0.1, maxval=1.1)

    fwd = jax.jit(accslp_forward)
    O = jax.block_until_ready(fwd(S, X, Z))

    S_pred_inf = jax.block_until_ready(accslp_inference())

    print("KERNEL_OK")
</pallas_src>

<mosaic_0001>
module attributes {stable_mosaic.version = 11 : i64} {
  func.func @_accslp_fused_kernel(%arg0: memref<16x16xf32, #tpu.memory_space<vmem>>, %arg1: memref<16x16xf32, #tpu.memory_space<vmem>>, %arg2: memref<16x16xf32, #tpu.memory_space<vmem>>, %arg3: memref<1x1xf32, #tpu.memory_space<smem>>) attributes {dimension_semantics = [], scalar_prefetch = 0 : i64, scratch_operands = 0 : i64, tpu.core_type = #tpu.core_type<tc>} {
    %c0 = arith.constant 0 : index
    %c0_0 = arith.constant 0 : index
    %0 = vector.load %arg0[%c0, %c0_0] : memref<16x16xf32, #tpu.memory_space<vmem>>, vector<16x16xf32>
    %c0_1 = arith.constant 0 : index
    %c0_2 = arith.constant 0 : index
    %1 = vector.load %arg1[%c0_1, %c0_2] : memref<16x16xf32, #tpu.memory_space<vmem>>, vector<16x16xf32>
    %c0_3 = arith.constant 0 : index
    %c0_4 = arith.constant 0 : index
    %2 = vector.load %arg2[%c0_3, %c0_4] : memref<16x16xf32, #tpu.memory_space<vmem>>, vector<16x16xf32>
    %cst = arith.constant 1.000000e+00 : f32
    %3 = vector.broadcast %cst : f32 to vector<16x8xf32>
    %cst_5 = arith.constant 1.000000e+00 : f32
    %4 = vector.broadcast %cst_5 : f32 to vector<16x8xf32>
    %cst_6 = arith.constant 1.000000e+00 : f32
    %5 = vector.broadcast %cst_6 : f32 to vector<8x16xf32>
    %cst_7 = arith.constant 1.000000e+00 : f32
    %6 = vector.broadcast %cst_7 : f32 to vector<8x16xf32>
    %cst_8 = arith.constant 8.000000e+00 : f32
    %7 = vector.broadcast %cst_8 : f32 to vector<16x16xf32>
    %8 = math.log %7 : vector<16x16xf32>
    %9 = arith.mulf %0, %8 : vector<16x16xf32>
    %10 = arith.subf %7, %9 : vector<16x16xf32>
    %11 = math.log %7 : vector<16x16xf32>
    %12 = arith.mulf %1, %11 : vector<16x16xf32>
    %13 = arith.subf %7, %12 : vector<16x16xf32>
    %cst_9 = arith.constant 5.000000e-01 : f32
    %14 = vector.broadcast %cst_9 : f32 to vector<16x16xf32>
    %15 = arith.mulf %14, %13 : vector<16x16xf32>
    %16 = arith.addf %10, %15 : vector<16x16xf32>
    %17 = math.log %7 : vector<16x16xf32>
    %18 = arith.mulf %2, %17 : vector<16x16xf32>
    %19 = arith.subf %7, %18 : vector<16x16xf32>
    %cst_10 = arith.constant 5.000000e-01 : f32
    %20 = vector.broadcast %cst_10 : f32 to vector<16x16xf32>
    %21 = arith.mulf %20, %19 : vector<16x16xf32>
    %22 = arith.addf %16, %21 : vector<16x16xf32>
    %23 = vector.shape_cast %22 : vector<16x16xf32> to vector<1x16x16xf32>
    %cst_11 = arith.constant dense<0.000000e+00> : vector<1xf32>
    %24 = vector.multi_reduction <add>, %23, %cst_11 [1, 2] : vector<1x16x16xf32> to vector<1xf32>
    %25 = vector.shape_cast %24 : vector<1xf32> to vector<1x1x1xf32>
    %26 = vector.extract %25[0, 0, 0] : f32 from vector<1x1x1xf32>
    %27 = arith.divf %0, %7 : vector<16x16xf32>
    %28 = arith.divf %1, %7 : vector<16x16xf32>
    %29 = arith.divf %2, %7 : vector<16x16xf32>
    %cst_12 = arith.constant 0.000000e+00 : f32
    %30:9 = scf.while (%arg4 = %26, %arg5 = %cst_12, %arg6 = %3, %arg7 = %5, %arg8 = %4, %arg9 = %6, %arg10 = %27, %arg11 = %28, %arg12 = %29) : (f32, f32, vector<16x8xf32>, vector<8x16xf32>, vector<16x8xf32>, vector<8x16xf32>, vector<16x16xf32>, vector<16x16xf32>, vector<16x16xf32>) -> (f32, f32, vector<16x8xf32>, vector<8x16xf32>, vector<16x8xf32>, vector<8x16xf32>, vector<16x16xf32>, vector<16x16xf32>, vector<16x16xf32>) {
      %cst_15 = arith.constant 0.000000e+00 : f32
      %32 = arith.cmpf ogt, %arg4, %cst_15 : f32
      scf.condition(%32) %arg4, %arg5, %arg6, %arg7, %arg8, %arg9, %arg10, %arg11, %arg12 : f32, f32, vector<16x8xf32>, vector<8x16xf32>, vector<16x8xf32>, vector<8x16xf32>, vector<16x16xf32>, vector<16x16xf32>, vector<16x16xf32>
    } do {
    ^bb0(%arg4: f32, %arg5: f32, %arg6: vector<16x8xf32>, %arg7: vector<8x16xf32>, %arg8: vector<16x8xf32>, %arg9: vector<8x16xf32>, %arg10: vector<16x16xf32>, %arg11: vector<16x16xf32>, %arg12: vector<16x16xf32>):
      %cst_15 = arith.constant 5.000000e-01 : f32
      %32 = vector.broadcast %cst_15 : f32 to vector<8x16xf32>
      %33 = arith.mulf %32, %arg9 : vector<8x16xf32>
      %34 = arith.addf %arg7, %33 : vector<8x16xf32>
      %35 = tpu.reciprocal %34 : vector<8x16xf32> -> vector<8x16xf32>
      %36 = arith.mulf %arg7, %35 : vector<8x16xf32>
      %cst_16 = arith.constant dense<0.000000e+00> : vector<16x8xf32>
      %37 = tpu.matmul %arg10, %36, %cst_16 {dimension_numbers = #tpu.dot_dimension_numbers<[1], [1], [0], [0], [0, 0, 1, 0], [], []>} : vector<16x16xf32>, vector<8x16xf32>, vector<16x8xf32> -> vector<16x8xf32>
      %38 = arith.mulf %arg9, %35 : vector<8x16xf32>
      %cst_17 = arith.constant dense<0.000000e+00> : vector<16x8xf32>
      %39 = tpu.matmul %arg12, %38, %cst_17 {dimension_numbers = #tpu.dot_dimension_numbers<[1], [1], [0], [0], [0, 0, 1, 0], [], []>} : vector<16x16xf32>, vector<8x16xf32>, vector<16x8xf32> -> vector<16x8xf32>
      %cst_18 = arith.constant 5.000000e-01 : f32
      %40 = vector.broadcast %cst_18 : f32 to vector<16x8xf32>
      %41 = arith.mulf %40, %39 : vector<16x8xf32>
      %42 = arith.addf %37, %41 : vector<16x8xf32>
      %43 = arith.mulf %arg6, %42 : vector<16x8xf32>
      %cst_19 = arith.constant dense<0.000000e+00> : vector<16x16xf32>
      %44 = tpu.matmul %43, %arg7, %cst_19 {dimension_numbers = #tpu.dot_dimension_numbers<[1], [0], [0], [1], [0, 0, 1, 1], [], []>} : vector<16x8xf32>, vector<8x16xf32>, vector<16x16xf32> -> vector<16x16xf32>
      %cst_20 = arith.constant dense<0.000000e+00> : vector<16x16xf32>
      %45 = tpu.matmul %43, %arg9, %cst_20 {dimension_numbers = #tpu.dot_dimension_numbers<[1], [0], [0], [1], [0, 0, 1, 1], [], []>} : vector<16x8xf32>, vector<8x16xf32>, vector<16x16xf32> -> vector<16x16xf32>
      %46 = arith.divf %0, %44 : vector<16x16xf32>
      %47 = arith.divf %2, %45 : vector<16x16xf32>
      %cst_21 = arith.constant 5.000000e-01 : f32
      %48 = vector.broadcast %cst_21 : f32 to vector<16x8xf32>
      %49 = arith.mulf %48, %arg8 : vector<16x8xf32>
      %50 = arith.addf %43, %49 : vector<16x8xf32>
      %51 = tpu.reciprocal %50 : vector<16x8xf32> -> vector<16x8xf32>
      %52 = arith.mulf %43, %51 : vector<16x8xf32>
      %53 = arith.mulf %arg8, %51 : vector<16x8xf32>
      %cst_22 = arith.constant 5.000000e-01 : f32
      %54 = vector.broadcast %cst_22 : f32 to vector<16x8xf32>
      %55 = arith.mulf %54, %53 : vector<16x8xf32>
      %56 = tpu.concatenate %52, %55 in 0 : vector<16x8xf32>, vector<16x8xf32> -> vector<32x8xf32>
      %57 = tpu.concatenate %46, %arg11 in 0 : vector<16x16xf32>, vector<16x16xf32> -> vector<32x16xf32>
      %cst_23 = arith.constant dense<0.000000e+00> : vector<8x16xf32>
      %58 = tpu.matmul %56, %57, %cst_23 {dimension_numbers = #tpu.dot_dimension_numbers<[0], [0], [1], [1], [0, 1, 1, 1], [], []>} : vector<32x8xf32>, vector<32x16xf32>, vector<8x16xf32> -> vector<8x16xf32>
      %59 = arith.mulf %arg7, %58 : vector<8x16xf32>
      %60 = tpu.concatenate %43, %arg8 in 0 : vector<16x8xf32>, vector<16x8xf32> -> vector<32x8xf32>
      %cst_24 = arith.constant dense<0.000000e+00> : vector<32x16xf32>
      %61 = tpu.matmul %60, %59, %cst_24 {dimension_numbers = #tpu.dot_dimension_numbers<[1], [0], [0], [1], [0, 0, 1, 1], [], []>} : vector<32x8xf32>, vector<8x16xf32>, vector<32x16xf32> -> vector<32x16xf32>
      %62 = vector.extract_strided_slice %61 {offsets = [0, 0], sizes = [16, 16], strides = [1, 1]} : vector<32x16xf32> to vector<16x16xf32>
      %63 = vector.extract_strided_slice %61 {offsets = [16, 0], sizes = [16, 16], strides = [1, 1]} : vector<32x16xf32> to vector<16x16xf32>
      %64 = arith.divf %0, %62 : vector<16x16xf32>
      %65 = arith.divf %1, %63 : vector<16x16xf32>
      %cst_25 = arith.constant dense<0.000000e+00> : vector<16xf32>
      %66 = vector.multi_reduction <add>, %65, %cst_25 [1] : vector<16x16xf32> to vector<16xf32>
      %67 = vector.shape_cast %66 : vector<16xf32> to vector<16x1xf32>
      %68 = vector.broadcast %67 : vector<16x1xf32> to vector<16x8xf32>
      %69 = arith.mulf %arg8, %68 : vector<16x8xf32>
      %70 = vector.broadcast %67 : vector<16x1xf32> to vector<16x16xf32>
      %71 = arith.mulf %70, %63 : vector<16x16xf32>
      %72 = arith.divf %1, %71 : vector<16x16xf32>
      %cst_26 = arith.constant dense<0.000000e+00> : vector<16xf32>
      %73 = vector.multi_reduction <add>, %47, %cst_26 [0] : vector<16x16xf32> to vector<16xf32>
      %74 = vector.shape_cast %73 : vector<16xf32> to vector<1x16xf32>
      %75 = vector.broadcast %74 : vector<1x16xf32> to vector<8x16xf32>
      %76 = arith.mulf %arg9, %75 : vector<8x16xf32>
      %77 = vector.broadcast %74 : vector<1x16xf32> to vector<16x16xf32>
      %78 = arith.mulf %77, %45 : vector<16x16xf32>
      %79 = arith.divf %2, %78 : vector<16x16xf32>
      %80 = math.log %62 : vector<16x16xf32>
      %81 = arith.mulf %0, %80 : vector<16x16xf32>
      %82 = arith.subf %62, %81 : vector<16x16xf32>
      %83 = math.log %71 : vector<16x16xf32>
      %84 = arith.mulf %1, %83 : vector<16x16xf32>
      %85 = arith.subf %71, %84 : vector<16x16xf32>
      %cst_27 = arith.constant 5.000000e-01 : f32
      %86 = vector.broadcast %cst_27 : f32 to vector<16x16xf32>
      %87 = arith.mulf %86, %85 : vector<16x16xf32>
      %88 = arith.addf %82, %87 : vector<16x16xf32>
      %89 = math.log %78 : vector<16x16xf32>
      %90 = arith.mulf %2, %89 : vector<16x16xf32>
      %91 = arith.subf %78, %90 : vector<16x16xf32>
      %cst_28 = arith.constant 5.000000e-01 : f32
      %92 = vector.broadcast %cst_28 : f32 to vector<16x16xf32>
      %93 = arith.mulf %92, %91 : vector<16x16xf32>
      %94 = arith.addf %88, %93 : vector<16x16xf32>
      %95 = vector.shape_cast %94 : vector<16x16xf32> to vector<1x16x16xf32>
      %cst_29 = arith.constant dense<0.000000e+00> : vector<1xf32>
      %96 = vector.multi_reduction <add>, %95, %cst_29 [1, 2] : vector<1x16x16xf32> to vector<1xf32>
      %97 = vector.shape_cast %96 : vector<1xf32> to vector<1x1x1xf32>
      %98 = vector.extract %97[0, 0, 0] : f32 from vector<1x1x1xf32>
      %99 = arith.subf %arg4, %98 : f32
      scf.yield %99, %98, %43, %59, %69, %76, %64, %72, %79 : f32, f32, vector<16x8xf32>, vector<8x16xf32>, vector<16x8xf32>, vector<8x16xf32>, vector<16x16xf32>, vector<16x16xf32>, vector<16x16xf32>
    }
    %c0_13 = arith.constant 0 : index
    %c0_14 = arith.constant 0 : index
    %31 = memref.load %arg3[%c0_13, %c0_14] : memref<1x1xf32, #tpu.memory_space<smem>>
    memref.store %30#1, %arg3[%c0_13, %c0_14] : memref<1x1xf32, #tpu.memory_space<smem>>
    return
  }
}

</mosaic_0001>

<bundles_post_ra>
// kernel: accslp_forward.1
= control target key start
LH: loop header
LB: loop body
LE: loop exit
PB: predicated region body
PF: predicated region fallthrough
CT: control target
= control target key end

     0   :  { %8 = vsyncpa [#allocation3], 0  ;;  %s1409_s0 = inlined_call_operand.hbm [shape: f32[16,16], index: 0, kind: input, shape index: {}]   ;;  %s1410_s1 = inlined_call_operand.hbm [shape: f32[16,16], index: 1, kind: input, shape index: {}]   ;;  %s1411_s2 = inlined_call_operand.hbm [shape: f32[16,16], index: 2, kind: input, shape index: {}]   ;;  %s1412_s3 = inlined_call_operand.hbm [shape: f32[1,1], index: 3, kind: output, shape index: {}]  }
   0x1   :  { %9 = vsyncpa [#allocation6], 0 }
   0x2   :  { %10 = vsyncpa [#allocation4], 0  ;;  %s28_s14 = sshll.u32 %s1410_s1, 4  ;;  %s1099_s15 = smov [#allocation5]   ;;  %s29_s14 = int_to_ptr.hbm [resolvable:$true] %s28_s14 }
   0x3   :  { %s30_s16 = sshll.u32 %s1099_s15, 4  ;;  %s15_s19 = sshll.u32 %s1409_s0, 4  ;;  %s31_s16 = int_to_ptr.vmem [resolvable:$true] %s30_s16  ;;  %s16_s19 = int_to_ptr.hbm [resolvable:$true] %s15_s19 }
   0x4   :  { %s1100_s20 = smov 128   ;;  %s1101_s21 = smov 8  }
   0x5   :  { %36 = dma.hbm_to_vmem [thread:$0]  %s29_s14, 256, %s31_s16, [#allocation6], %s1100_s20, %s1100_s20, %s1101_s21  }
   0x6   :  { %s1102_s22 = smov [#allocation2]   ;;  %s41_s26 = sshll.u32 %s1411_s2, 4  ;;  %s42_s26 = int_to_ptr.hbm [resolvable:$true] %s41_s26 }
   0x7   :  { %s17_s23 = sshll.u32 %s1102_s22, 4  ;;  %s1103_s1 = smov [#allocation7]   ;;  %s18_s23 = int_to_ptr.vmem [resolvable:$true] %s17_s23 }
   0x8   :  { %23 = dma.hbm_to_vmem [thread:$0]  %s16_s19, 256, %s18_s23, [#allocation3], %s1100_s20, %s1100_s20, %s1101_s21  }
   0x9   :  { %s43_s27 = sshll.u32 %s1103_s1, 4  ;;  %s44_s27 = int_to_ptr.vmem [resolvable:$true] %s43_s27 }
   0xa   :  { %49 = dma.hbm_to_vmem [thread:$0]  %s42_s26, 256, %s44_s27, [#allocation6], %s1100_s20, %s1100_s20, %s1101_s21  }
   0xb   :  { %1037 = dma.done.wait [#allocation3], 256  }
   0xc   :  { %1038 = vsyncadd [#allocation3], 4294967040 }
   0xd   :  { %1039 = dma.done.wait [#allocation6], 512  }
   0xe   :  { %1040 = vsyncadd [#allocation6], 4294966784  ;;  %v1104_v0 = vmov 8.0   ;;  %v1135_v2 = vld [vmem:[#allocation2] sm:$0xff]  ;;  %v1137_v3 = vld [vmem:[#allocation2 + $0x8] sm:$0xff]  ;;  %vm88_vm1 = vcmask 130048  }
   0xf   :  { %853 = vrcp.f32 %v1104_v0  ;;  %v1139_v4 = vld [vmem:[#allocation5] sm:$0xff]  ;;  %v1141_v5 = vld [vmem:[#allocation5 + $0x8] sm:$0xff]  ;;  %v1143_v6 = vld [vmem:[#allocation7] sm:$0xff]  ;;  %v68_v8 = vmul.f32 2.0794415, %v1135_v2  ;;  %s1161_s2 = smov 0.0  }
  0x10   :  { %v1145_v7 = vld [vmem:[#allocation7 + $0x8] sm:$0xff]  ;;  %v69_v10 = vmul.f32 2.0794415, %v1137_v3  ;;  %v72_v11 = vmul.f32 2.0794415, %v1139_v4 }
  0x11   :  { %v73_v12 = vmul.f32 2.0794415, %v1141_v5  ;;  %v80_v13 = vmul.f32 2.0794415, %v1143_v6  ;;  %v81_v14 = vmul.f32 2.0794415, %v1145_v7 }
  0x12   :  { %v70_v16 = vsub.f32 8.0, %v68_v8  ;;  %v71_v17 = vsub.f32 8.0, %v69_v10  ;;  %v74_v18 = vsub.f32 8.0, %v72_v11 }
  0x13   :  { %v75_v19 = vsub.f32 8.0, %v73_v12  ;;  %v82_v20 = vsub.f32 8.0, %v80_v13  ;;  %v83_v21 = vsub.f32 8.0, %v81_v14 }
  0x14   :  { %v76_v23 = vmul.f32 0.5, %v74_v18 }
  0x15   :  { %v854_v1 = vpop.eup %853  ;;  %v77_v24 = vmul.f32 0.5, %v75_v19  ;;  %v84_v25 = vmul.f32 0.5, %v82_v20  ;;  %v85_v26 = vmul.f32 0.5, %v83_v21 }
  0x16   :  { %v102_v9 = vmul.f32 8.0, %v854_v1  ;;  %vm106_vm0 = vweird.f32 %v854_v1  ;;  %v78_v28 = vadd.f32 %v76_v23, %v70_v16 }
  0x17   :  { %v79_v29 = vadd.f32 %v77_v24, %v71_v17 }
  0x18   :  { %v103_v15 = vsub.f32 1.0, %v102_v9  ;;  %v86_v31 = vadd.f32 %v84_v25, %v78_v28 }
  0x19   :  { %v87_v32 = vadd.f32 %v85_v26, %v79_v29 }
  0x1a   :  { %v104_v22 = vmul.f32 %v854_v1, %v103_v15  ;;  %v89_v39 = vsel %vm88_vm1, %v86_v31, 0.0 }
  0x1b   :  { %v90_v40 = vsel %vm88_vm1, %v87_v32, 0.0 }
  0x1c   :  { %v105_v27 = vadd.f32 %v854_v1, %v104_v22  ;;  %v91_v41 = vadd.f32 %v90_v40, %v89_v39 }
  0x1e   :  { %v107_v30 = vsel %vm106_vm0, %v854_v1, %v105_v27  ;;  %92 = vadd.xlane.f32.xlu0 %v91_v41 }
  0x1f   :  { %v108_v33 = vmul.f32 %v107_v30, %v1135_v2   ;;  %v109_v34 = vmul.f32 %v107_v30, %v1137_v3   ;;  %v110_v35 = vmul.f32 %v107_v30, %v1139_v4   ;;  %v111_v36 = vmul.f32 %v107_v30, %v1141_v5  }
  0x20   :  { %v112_v37 = vmul.f32 %v107_v30, %v1143_v6   ;;  %v113_v38 = vmul.f32 %v107_v30, %v1145_v7  }
  0x91   :  { %v93_v42 = vpop.xlane.xlu0 %92 }
  0x92   :  { %v94_v43 = vrot.slane %v93_v42, 4 }
  0x94   :  { %v95_v44 = vadd.f32 %v94_v43, %v93_v42 }
  0x96   :  { %v96_v45 = vrot.slane %v95_v44, 2 }
  0x98   :  { %v97_v46 = vadd.f32 %v96_v45, %v95_v44 }
  0x9a   :  { %v98_v47 = vrot.slane %v97_v46, 1 }
  0x9c   :  { %v99_v48 = vadd.f32 %v98_v47, %v97_v46 }
  0x9e   :  { %729 = vpush %v99_v48 }
  0xcf   :  { %s730_s0 = spop %729  }
  0xd0   :  { %p682_p0 = scmp.gt.f32.partialorder %s730_s0, 0.0 }
  0xd1   :  { %v1175_v49 = vmov (%p682_p0), 1.0   ;;  %v1177_v50 = vmov (%p682_p0), 1.0   ;;  %v1179_v51 = vmov (%p682_p0), 1.0   ;;  %v1181_v52 = vmov (%p682_p0), 1.0  }
  0xd2   :  { %684 = sbr.rel (!%p682_p0) target bundleno = 1204 (0x4b4), region = 46  ;;  %v1183_v53 = vmov (%p682_p0), 1.0   ;;  %v1185_v54 = vmov (%p682_p0), 1.0  }
  0xd7 LB: > { %v133_v55 = vmul.f32 0.5, %v1069_v49  ;;  %241 = vmatpush.msra.mxu2 %v1081_v52  ;;  %v332_v16 = vmul.f32 0.5, %v1077_v51  ;;  %vm219_vm6 = vcmask 64512   ;;  %v333_v21 = vmul.f32 0.5, %v1073_v50  ;;  %s1093_s0 = sphi %s730_s0, %s1413_s0   ;;  %v1089_v54 = vphi %v1185_v54, %v1230_v54   ;;  %v1085_v53 = vphi %v1183_v53, %v1238_v53   ;;  %v1081_v52 = vphi %v1181_v52, %v1306_v52   ;;  %v1077_v51 = vphi %v1179_v51, %v1342_v51   ;;  %v1073_v50 = vphi %v1177_v50, %v1349_v50   ;;  %v1069_v49 = vphi %v1175_v49, %v1281_v49   ;;  %v1065_v33 = vphi %v108_v33, %v1329_v33   ;;  %v1061_v34 = vphi %v109_v34, %v1335_v34   ;;  %v1057_v35 = vphi %v110_v35, %v546_v35   ;;  %v1053_v36 = vphi %v111_v36, %v561_v36   ;;  %v1049_v37 = vphi %v112_v37, %v1300_v37   ;;  %v1045_v38 = vphi %v113_v38, %v1303_v38  }
  0xd9   : > { %v134_v56 = vadd.f32 %v1081_v52, %v133_v55  ;;  %418 = vmatpush.msrb.mxu2 %v1053_v36 }
  0xdb   : > { %855 = vrcp.f32 %v134_v56  ;;  %v146_v59 = vand.u32 2147483648, %v134_v56  ;;  %vm140_vm2 = vweird.f32 %v134_v56  ;;  %v144_v61 = vand.u32 2147483647, %v134_v56  ;;  %419 = vmatpush.msrb.mxu2 %v1057_v35 }
  0xdd   : > { %v147_v63 = vor.u32 1.1754944e-38, %v146_v59  ;;  %vm145_vm5 = vcmp.eq.f32.partialorder %v144_v61, 8.507059e+37 }
  0xe1   : > { %v856_v57 = vpop.eup %855 }
  0xe2   : > { %v136_v58 = vmul.f32 %v856_v57, %v134_v56  ;;  %vm141_vm3 = vweird.f32 %v856_v57 }
  0xe3   : > { %vm142_vm4 = vmor %vm140_vm2, %vm141_vm3 }
  0xe4   : > { %v137_v60 = vsub.f32 1.0, %v136_v58 }
  0xe6   : > { %v138_v62 = vmul.f32 %v856_v57, %v137_v60 }
  0xe8   : > { %v139_v0 = vadd.f32 %v856_v57, %v138_v62 }
  0xea   : > { %v143_v1 = vsel %vm142_vm4, %v856_v57, %v139_v0 }
  0xeb   : > { %v148_v8 = vsel %vm145_vm5, %v147_v63, %v143_v1 }
  0xec   : > { %v150_v9 = vmul.f32 %v1069_v49, %v148_v8  ;;  %v149_v10 = vmul.f32 %v1081_v52, %v148_v8 }
  0xee   : > { %728 = vmatpush.xpose.msk.msra.mxu1 %vm88_vm1, %v150_v9  ;;  %713 = vmatpush.xpose.msk.msra.mxu0 %vm88_vm1, %v150_v9 }
  0xf1   : > { %715 = vmatmul.msk.f32.vlgmr.msra.gmra.mxu1 %vm88_vm1, %v1045_v38  ;;  %714 = vmatmul.msk.f32.vlgmr.msra.gmra.mxu0 %vm88_vm1, %v1049_v37 }
  0xf2   : > { %716 = vmatpush.xpose.msk.msrb.mxu1 %vm88_vm1, %v149_v10  ;;  %264 = vmatpush.msrb.mxu0 %v1069_v49 }
  0xf9   : > { %717 = vmatmul.msk.f32.vlgmr.msrb.gmra.mxu1 %vm88_vm1, %v1065_v33 }
 0x101   : > { %718 = vmatmul.msk.f32.gmra.mxu1 %vm88_vm1, %v1061_v34 }
 0x16e   : > { %v180_v11 = vpop.f32.mrf.mxu1  ;;  %v177_v12 = vpop.f32.mrf.mxu0 }
 0x16f   : > { %v183_v13 = vmul.f32 0.5, %v177_v12  ;;  %v184_v18 = vmul.f32 0.5, %v180_v11 }
 0x176   : > { %v211_v14 = vpop.f32.mrf.mxu1 }
 0x177   : > { %v212_v15 = vadd.f32 %v211_v14, %v183_v13 }
 0x179   : > { %v1230_v54 = vmul.f32 %v1089_v54, %v212_v15  }
 0x17b   : > { %v334_v17 = vadd.f32 %v332_v16, %v1230_v54  ;;  %719 = vmatmul.msk.f32.vlgmr.msra.gmra.mxu2 %vm219_vm6, %v1230_v54  ;;  %721 = vmatmul.msk.f32.vlgmr.msrb.gmra.mxu0 %vm219_vm6, %v1230_v54 }
 0x17d   : > { %857 = vrcp.f32 %v334_v17  ;;  %v347_v26 = vand.u32 2147483648, %v334_v17  ;;  %v345_v28 = vand.u32 2147483647, %v334_v17  ;;  %vm341_vm8 = vweird.f32 %v334_v17 }
 0x17e   : > { %v214_v19 = vpop.f32.mrf.mxu1 }
 0x17f   : > { %v215_v20 = vadd.f32 %v214_v19, %v184_v18  ;;  %v348_v31 = vor.u32 1.1754944e-38, %v347_v26  ;;  %vm346_vm10 = vcmp.eq.f32.partialorder %v345_v28, 8.507059e+37 }
 0x181   : > { %v1238_v53 = vmul.f32 %v1085_v53, %v215_v20  }
 0x183   : > { %v858_v22 = vpop.eup %857  ;;  %v335_v23 = vadd.f32 %v333_v21, %v1238_v53  ;;  %720 = vmatmul.msk.f32.gmra.mxu2 %vm219_vm6, %v1238_v53  ;;  %722 = vmatmul.msk.f32.gmra.mxu0 %vm219_vm6, %v1238_v53 }
 0x184   : > { %v337_v24 = vmul.f32 %v858_v22, %v334_v17  ;;  %vm342_vm7 = vweird.f32 %v858_v22 }
 0x185   : > { %859 = vrcp.f32 %v335_v23  ;;  %vm343_vm9 = vmor %vm341_vm8, %vm342_vm7  ;;  %v361_v39 = vand.u32 2147483648, %v335_v23  ;;  %v359_v41 = vand.u32 2147483647, %v335_v23  ;;  %vm355_vm12 = vweird.f32 %v335_v23 }
 0x186   : > { %v338_v25 = vsub.f32 1.0, %v337_v24 }
 0x187   : > { %v362_v43 = vor.u32 1.1754944e-38, %v361_v39  ;;  %vm360_vm14 = vcmp.eq.f32.partialorder %v359_v41, 8.507059e+37 }
 0x188   : > { %v339_v27 = vmul.f32 %v858_v22, %v338_v25 }
 0x18a   : > { %v340_v29 = vadd.f32 %v858_v22, %v339_v27 }
 0x18b   : > { %v860_v30 = vpop.eup %859 }
 0x18c   : > { %v344_v32 = vsel %vm343_vm9, %v858_v22, %v340_v29  ;;  %v351_v33 = vmul.f32 %v860_v30, %v335_v23  ;;  %vm356_vm11 = vweird.f32 %v860_v30 }
 0x18d   : > { %v349_v34 = vsel %vm346_vm10, %v348_v31, %v344_v32  ;;  %vm357_vm13 = vmor %vm355_vm12, %vm356_vm11 }
 0x18e   : > { %v364_v37 = vmul.f32 %v349_v34, %v1230_v54  ;;  %v352_v38 = vsub.f32 1.0, %v351_v33  ;;  %v366_v47 = vmul.f32 %v1077_v51, %v349_v34 }
 0x190   : > { %370 = vxpose.xlu0.b32.start [1/4] (short) (narrow) %v364_v37, 8  ;;  %v353_v40 = vmul.f32 %v860_v30, %v352_v38  ;;  %v368_v48 = vmul.f32 0.5, %v366_v47 }
 0x192   : > { %v354_v42 = vadd.f32 %v860_v30, %v353_v40 }
 0x194   : > { %v358_v44 = vsel %vm357_vm13, %v860_v30, %v354_v42 }
 0x195   : > { %v363_v45 = vsel %vm360_vm14, %v362_v43, %v358_v44 }
 0x196   : > { %v365_v46 = vmul.f32 %v363_v45, %v1238_v53  ;;  %v367_v55 = vmul.f32 %v1073_v50, %v363_v45 }
 0x198   : > { %371 = vxpose.xlu0.b32.cont [2/4] (short) (narrow) %v365_v46, 8  ;;  %v369_v56 = vmul.f32 0.5, %v367_v55 }
 0x1a0   : > { %372 = vxpose.xlu0.b32.cont [3/4] (short) (narrow) %v368_v48, 8 }
 0x1a8   : > { %373 = vxpose.xlu0.b32.end [4/4] (short) (narrow) %v369_v56, 8 }
 0x1f8   : > { %v1250_v57 = vpop.f32.mrf.mxu0 }
 0x1f9   : > { %861 = vrcp.f32 %v1250_v57  ;;  %v313_v9 = vand.u32 2147483648, %v1250_v57  ;;  %vm307_vm0 = vweird.f32 %v1250_v57  ;;  %v311_v10 = vand.u32 2147483647, %v1250_v57 }
 0x1fb   : > { %v314_v15 = vor.u32 1.1754944e-38, %v313_v9  ;;  %vm312_vm3 = vcmp.eq.f32.partialorder %v311_v10, 8.507059e+37 }
 0x1fe   : > { %v1254_v58 = vpop.f32.mrf.mxu2 }
 0x1ff   : > { %v862_v59 = vpop.eup %861  ;;  %863 = vrcp.f32 %v1254_v58  ;;  %vm277_vm9 = vweird.f32 %v1254_v58  ;;  %v281_v31 = vand.u32 2147483647, %v1254_v58  ;;  %v283_v32 = vand.u32 2147483648, %v1254_v58 }
 0x200   : > { %v303_v60 = vmul.f32 %v862_v59, %v1250_v57  ;;  %v1258_v61 = vpop.f32.mrf.mxu0  ;;  %vm308_vm15 = vweird.f32 %v862_v59 }
 0x201   : > { %865 = vrcp.f32 %v1258_v61  ;;  %vm309_vm2 = vmor %vm307_vm0, %vm308_vm15  ;;  %v326_v16 = vand.u32 2147483647, %v1258_v61  ;;  %v328_v17 = vand.u32 2147483648, %v1258_v61  ;;  %vm322_vm5 = vweird.f32 %v1258_v61 }
 0x202   : > { %v304_v62 = vsub.f32 1.0, %v303_v60  ;;  %v284_v44 = vor.u32 1.1754944e-38, %v283_v32  ;;  %vm282_vm0 = vcmp.eq.f32.partialorder %v281_v31, 8.507059e+37 }
 0x203   : > { %vm327_vm8 = vcmp.eq.f32.partialorder %v326_v16, 8.507059e+37  ;;  %v329_v24 = vor.u32 1.1754944e-38, %v328_v17 }
 0x204   : > { %v305_v63 = vmul.f32 %v862_v59, %v304_v62 }
 0x205   : > { %v864_v36 = vpop.eup %863 }
 0x206   : > { %v306_v0 = vadd.f32 %v862_v59, %v305_v63  ;;  %v273_v1 = vmul.f32 %v864_v36, %v1254_v58  ;;  %v246_v8 = vpop.f32.mrf.mxu2  ;;  %vm278_vm10 = vweird.f32 %v864_v36 }
 0x207   : > { %v866_v35 = vpop.eup %865  ;;  %867 = vrcp.f32 %v246_v8  ;;  %v298_v30 = vand.u32 2147483648, %v246_v8  ;;  %v296_v37 = vand.u32 2147483647, %v246_v8  ;;  %vm292_vm12 = vweird.f32 %v246_v8  ;;  %vm279_vm13 = vmor %vm277_vm9, %vm278_vm10 }
 0x208   : > { %v274_v11 = vsub.f32 1.0, %v273_v1  ;;  %v318_v12 = vmul.f32 %v866_v35, %v1258_v61  ;;  %v310_v13 = vsel %vm309_vm2, %v862_v59, %v306_v0  ;;  %vm323_vm4 = vweird.f32 %v866_v35 }
 0x209   : > { %v315_v21 = vsel %vm312_vm3, %v314_v15, %v310_v13  ;;  %vm324_vm7 = vmor %vm322_vm5, %vm323_vm4  ;;  %v299_v43 = vor.u32 1.1754944e-38, %v298_v30  ;;  %vm297_vm15 = vcmp.eq.f32.partialorder %v296_v37, 8.507059e+37  ;;  %vm402_vm5 = vcmask 261120  }
 0x20a   : > { %v319_v14 = vsub.f32 1.0, %v318_v12  ;;  %v275_v19 = vmul.f32 %v864_v36, %v274_v11  ;;  %v316_v25 = vmul.f32 %v315_v21, %v1143_v6 }
 0x20c   : > { %v320_v18 = vmul.f32 %v866_v35, %v319_v14  ;;  %v276_v28 = vadd.f32 %v864_v36, %v275_v19  ;;  %v562_v38 = vsel %vm88_vm1, %v316_v25, 0.0 }
 0x20d   : > { %v868_v20 = vpop.eup %867 }
 0x20e   : > { %v321_v22 = vadd.f32 %v866_v35, %v320_v18  ;;  %v288_v23 = vmul.f32 %v868_v20, %v246_v8  ;;  %vm293_vm11 = vweird.f32 %v868_v20  ;;  %v280_v41 = vsel %vm279_vm13, %v864_v36, %v276_v28 }
 0x20f   : > { %vm294_vm14 = vmor %vm292_vm12, %vm293_vm11  ;;  %v285_v48 = vsel %vm282_vm0, %v284_v44, %v280_v41 }
 0x210   : > { %v325_v26 = vsel %vm324_vm7, %v866_v35, %v321_v22  ;;  %v289_v27 = vsub.f32 1.0, %v288_v23  ;;  %v286_v58 = vmul.f32 %v285_v48, %v1135_v2 }
 0x211   : > { %v330_v29 = vsel %vm327_vm8, %v329_v24, %v325_v26 }
 0x212   : > { %v331_v33 = vmul.f32 %v330_v29, %v1145_v7  ;;  %v290_v34 = vmul.f32 %v868_v20, %v289_v27 }
 0x214   : > { %v563_v39 = vsel %vm88_vm1, %v331_v33, 0.0  ;;  %v291_v40 = vadd.f32 %v868_v20, %v290_v34 }
 0x215   : > { %v564_v42 = vadd.f32 %v563_v39, %v562_v38 }
 0x216   : > { %v295_v45 = vsel %vm294_vm14, %v868_v20, %v291_v40 }
 0x217   : > { %v565_v46 = vrot.slane %v564_v42, 4  ;;  %v300_v47 = vsel %vm297_vm15, %v299_v43, %v295_v45 }
 0x218   : > { %v301_v55 = vmul.f32 %v300_v47, %v1137_v3 }
 0x219   : > { %v566_v56 = vadd.f32 %v565_v46, %v564_v42 }
 0x21a   : > { %420 = vmatpush.msrb.mxu2 %v301_v55 }
 0x21b   : > { %v567_v59 = vrot.slane %v566_v56, 2 }
 0x21c   : > { %421 = vmatpush.msrb.mxu2 %v286_v58 }
 0x21d   : > { %v568_v60 = vadd.f32 %v567_v59, %v566_v56 }
 0x21f   : > { %v569_v62 = vrot.slane %v568_v60, 1 }
 0x221   : > { %v570_v63 = vadd.f32 %v569_v62, %v568_v60 }
 0x223   : > { %v1281_v49 = vmul.f32 %v1069_v49, %v570_v63   ;;  %v1284_v36 = vmul.f32 %v570_v63, %v1250_v57  ;;  %v1287_v0 = vmul.f32 %v570_v63, %v1258_v61 }
 0x225   : > { %869 = vrcp.f32 %v1284_v36  ;;  %v585_v11 = vand.u32 2147483648, %v1284_v36  ;;  %v583_v57 = vand.u32 2147483647, %v1284_v36  ;;  %v600_v61 = vand.u32 2147483648, %v1287_v0 }
 0x226   : > { %871 = vrcp.f32 %v1287_v0  ;;  %v598_v15 = vand.u32 2147483647, %v1287_v0  ;;  %vm579_vm4 = vweird.f32 %v1284_v36  ;;  %vm594_vm8 = vweird.f32 %v1287_v0 }
 0x227   : > { %v586_v17 = vor.u32 1.1754944e-38, %v585_v11  ;;  %vm584_vm9 = vcmp.eq.f32.partialorder %v583_v57, 8.507059e+37  ;;  %v601_v20 = vor.u32 1.1754944e-38, %v600_v61 }
 0x228   : > { %vm599_vm11 = vcmp.eq.f32.partialorder %v598_v15, 8.507059e+37 }
 0x22b   : > { %v870_v1 = vpop.eup %869 }
 0x22c   : > { %v872_v8 = vpop.eup %871  ;;  %v575_v35 = vmul.f32 %v870_v1, %v1284_v36  ;;  %vm580_vm2 = vweird.f32 %v870_v1 }
 0x22d   : > { %v590_v9 = vmul.f32 %v872_v8, %v1287_v0  ;;  %vm595_vm3 = vweird.f32 %v872_v8  ;;  %vm581_vm7 = vmor %vm579_vm4, %vm580_vm2 }
 0x22e   : > { %v576_v10 = vsub.f32 1.0, %v575_v35  ;;  %vm596_vm10 = vmor %vm594_vm8, %vm595_vm3 }
 0x22f   : > { %v591_v12 = vsub.f32 1.0, %v590_v9 }
 0x230   : > { %v577_v13 = vmul.f32 %v870_v1, %v576_v10 }
 0x231   : > { %v592_v14 = vmul.f32 %v872_v8, %v591_v12 }
 0x232   : > { %v578_v16 = vadd.f32 %v870_v1, %v577_v13 }
 0x233   : > { %v593_v18 = vadd.f32 %v872_v8, %v592_v14 }
 0x234   : > { %v582_v19 = vsel %vm581_vm7, %v870_v1, %v578_v16  ;;  %v386_v21 = vpop.trf.xlu0 }
 0x235   : > { %v587_v22 = vsel %vm584_vm9, %v586_v17, %v582_v19  ;;  %v597_v23 = vsel %vm596_vm10, %v872_v8, %v593_v18  ;;  %723 = vmatmul.msk.f32.vlgmr.msrb.gmra.mxu2 %vm402_vm5, %v386_v21 }
 0x236   : > { %v1300_v37 = vmul.f32 %v587_v22, %v1143_v6   ;;  %v602_v24 = vsel %vm599_vm11, %v601_v20, %v597_v23 }
 0x237   : > { %v1303_v38 = vmul.f32 %v602_v24, %v1145_v7  }
 0x2b8   : > { %v423_v25 = vpop.f32.mrf.mxu2 }
 0x2b9   : > { %v1306_v52 = vmul.f32 %v1081_v52, %v423_v25  }
 0x2bb   : > { %448 = vmatpush.msra.mxu3 %v1306_v52 }
 0x2bc   : > { %724 = vmatmul.msk.f32.vlgmr.msra.gmra.mxu3 %vm219_vm6, %v1230_v54 }
 0x2c4   : > { %725 = vmatmul.msk.f32.gmra.mxu3 %vm219_vm6, %v1238_v53 }
 0x2cc   : > { %726 = vmatmul.msk.f32.gmra.mxu3 %vm219_vm6, %v1077_v51 }
 0x2d4   : > { %727 = vmatmul.msk.f32.gmra.mxu3 %vm219_vm6, %v1073_v50 }
 0x33f   : > { %v1317_v26 = vpop.f32.mrf.mxu3 }
 0x340   : > { %873 = vrcp.f32 %v1317_v26  ;;  %v473_v31 = vand.u32 2147483648, %v1317_v26  ;;  %v471_v33 = vand.u32 2147483647, %v1317_v26  ;;  %vm467_vm6 = vweird.f32 %v1317_v26 }
 0x342   : > { %v474_v40 = vor.u32 1.1754944e-38, %v473_v31  ;;  %vm472_vm14 = vcmp.eq.f32.partialorder %v471_v33, 8.507059e+37 }
 0x346   : > { %v874_v27 = vpop.eup %873 }
 0x347   : > { %v463_v28 = vmul.f32 %v874_v27, %v1317_v26  ;;  %v1321_v29 = vpop.f32.mrf.mxu3  ;;  %vm468_vm12 = vweird.f32 %v874_v27 }
 0x348   : > { %875 = vrcp.f32 %v1321_v29  ;;  %vm469_vm13 = vmor %vm467_vm6, %vm468_vm12  ;;  %v488_v46 = vand.u32 2147483648, %v1321_v29  ;;  %v486_v48 = vand.u32 2147483647, %v1321_v29  ;;  %vm482_vm0 = vweird.f32 %v1321_v29 }
 0x349   : > { %v464_v30 = vsub.f32 1.0, %v463_v28 }
 0x34a   : > { %v489_v58 = vor.u32 1.1754944e-38, %v488_v46  ;;  %vm487_vm3 = vcmp.eq.f32.partialorder %v486_v48, 8.507059e+37 }
 0x34b   : > { %v465_v32 = vmul.f32 %v874_v27, %v464_v30 }
 0x34d   : > { %v466_v34 = vadd.f32 %v874_v27, %v465_v32 }
 0x34e   : > { %v876_v39 = vpop.eup %875 }
 0x34f   : > { %v470_v41 = vsel %vm469_vm13, %v874_v27, %v466_v34  ;;  %v478_v42 = vmul.f32 %v876_v39, %v1321_v29  ;;  %v456_v43 = vpop.f32.mrf.mxu3  ;;  %vm483_vm15 = vweird.f32 %v876_v39 }
 0x350   : > { %v475_v44 = vsel %vm472_vm14, %v474_v40, %v470_v41  ;;  %877 = vrcp.f32 %v456_v43  ;;  %vm484_vm2 = vmor %vm482_vm0, %vm483_vm15  ;;  %v503_v8 = vand.u32 2147483648, %v456_v43  ;;  %v501_v9 = vand.u32 2147483647, %v456_v43 }
 0x351   : > { %v1329_v33 = vmul.f32 %v475_v44, %v1135_v2   ;;  %v479_v45 = vsub.f32 1.0, %v478_v42  ;;  %vm497_vm5 = vweird.f32 %v456_v43 }
 0x352   : > { %v504_v12 = vor.u32 1.1754944e-38, %v503_v8  ;;  %vm502_vm8 = vcmp.eq.f32.partialorder %v501_v9, 8.507059e+37 }
 0x353   : > { %v480_v47 = vmul.f32 %v876_v39, %v479_v45 }
 0x355   : > { %v481_v55 = vadd.f32 %v876_v39, %v480_v47 }
 0x356   : > { %v878_v56 = vpop.eup %877 }
 0x357   : > { %v485_v59 = vsel %vm484_vm2, %v876_v39, %v481_v55  ;;  %v459_v60 = vpop.f32.mrf.mxu3  ;;  %v493_v62 = vmul.f32 %v878_v56, %v456_v43  ;;  %vm498_vm4 = vweird.f32 %v878_v56 }
 0x358   : > { %v490_v63 = vsel %vm487_vm3, %v489_v58, %v485_v59  ;;  %879 = vrcp.f32 %v459_v60  ;;  %vm499_vm7 = vmor %vm497_vm5, %vm498_vm4  ;;  %v518_v16 = vand.u32 2147483648, %v459_v60  ;;  %v516_v19 = vand.u32 2147483647, %v459_v60 }
 0x359   : > { %v1335_v34 = vmul.f32 %v490_v63, %v1137_v3   ;;  %v494_v1 = vsub.f32 1.0, %v493_v62  ;;  %vm512_vm10 = vweird.f32 %v459_v60  ;;  %881 = vlog2.f32 %v1284_v36 }
 0x35a   : > { %v519_v21 = vor.u32 1.1754944e-38, %v518_v16  ;;  %vm517_vm12 = vcmp.eq.f32.partialorder %v516_v19, 8.507059e+37  ;;  %883 = vlog2.f32 %v1317_v26 }
 0x35b   : > { %v495_v35 = vmul.f32 %v878_v56, %v494_v1 }
 0x35d   : > { %v496_v10 = vadd.f32 %v878_v56, %v495_v35 }
 0x35e   : > { %v880_v11 = vpop.eup %879 }
 0x35f   : > { %v508_v13 = vmul.f32 %v880_v11, %v459_v60  ;;  %v500_v57 = vsel %vm499_vm7, %v878_v56, %v496_v10  ;;  %vm513_vm9 = vweird.f32 %v880_v11  ;;  %v882_v30 = vpop.eup %881 }
 0x360   : > { %v505_v61 = vsel %vm502_vm8, %v504_v12, %v500_v57  ;;  %vm514_vm11 = vmor %vm512_vm10, %vm513_vm9  ;;  %v884_v31 = vpop.eup %883  ;;  %v625_v46 = vmul.f32 0.6931472, %v882_v30 }
 0x361   : > { %v509_v14 = vsub.f32 1.0, %v508_v13  ;;  %v506_v15 = vmul.f32 %v505_v61, %v1139_v4  ;;  %v605_v48 = vmul.f32 0.6931472, %v884_v31 }
 0x362   : > { %v628_v1 = vmul.f32 %v625_v46, %v1143_v6 }
 0x363   : > { %v522_v17 = vsel %vm88_vm1, %v506_v15, 0.0  ;;  %v510_v18 = vmul.f32 %v880_v11, %v509_v14  ;;  %v608_v10 = vmul.f32 %v605_v48, %v1135_v2 }
 0x364   : > { %523 = vadd.xlane.f32.xlu1 %v522_v17  ;;  %v630_v17 = vsub.f32 %v1284_v36, %v628_v1 }
 0x365   : > { %v511_v20 = vadd.f32 %v880_v11, %v510_v18 }
 0x367   : > { %v515_v22 = vsel %vm514_vm11, %v880_v11, %v511_v20  ;;  %v610_v20 = vsub.f32 %v1317_v26, %v608_v10 }
 0x368   : > { %v520_v23 = vsel %vm517_vm12, %v519_v21, %v515_v22 }
 0x369   : > { %v521_v24 = vmul.f32 %v520_v23, %v1141_v5 }
 0x36b   : > { %v525_v25 = vsel %vm88_vm1, %v521_v24, 0.0 }
 0x36c   : > { %526 = vadd.xlane.f32.xlu1 %v525_v25 }
 0x3d7   : > { %v524_v27 = vpop.xlane.xlu1 %523 }
 0x3d8   : > { %v1342_v51 = vmul.f32 %v1077_v51, %v524_v27   ;;  %v530_v28 = vmul.f32 %v524_v27, %v456_v43 }
 0x3da   : > { %885 = vrcp.f32 %v530_v28  ;;  %v543_v47 = vand.u32 2147483648, %v530_v28  ;;  %v541_v58 = vand.u32 2147483647, %v530_v28  ;;  %vm537_vm13 = vweird.f32 %v530_v28 }
 0x3db   : > { %887 = vlog2.f32 %v530_v28 }
 0x3dc   : > { %889 = vlog2.f32 %v1287_v0  ;;  %v544_v35 = vor.u32 1.1754944e-38, %v543_v47  ;;  %vm542_vm15 = vcmp.eq.f32.partialorder %v541_v58, 8.507059e+37 }
 0x3dd   : > { %891 = vlog2.f32 %v1321_v29 }
 0x3df   : > { %v527_v32 = vpop.xlane.xlu1 %526 }
 0x3e0   : > { %v886_v39 = vpop.eup %885  ;;  %v1349_v50 = vmul.f32 %v1073_v50, %v527_v32   ;;  %v531_v40 = vmul.f32 %v527_v32, %v459_v60  ;;  %v632_v32 = vmul.f32 0.5, %v630_v17 }
 0x3e1   : > { %v888_v41 = vpop.eup %887  ;;  %v533_v42 = vmul.f32 %v886_v39, %v530_v28  ;;  %vm538_vm6 = vweird.f32 %v886_v39 }
 0x3e2   : > { %893 = vrcp.f32 %v531_v40  ;;  %v890_v43 = vpop.eup %889  ;;  %v613_v45 = vmul.f32 0.6931472, %v888_v41  ;;  %vm539_vm14 = vmor %vm537_vm13, %vm538_vm6  ;;  %v558_v18 = vand.u32 2147483648, %v531_v40  ;;  %v556_v23 = vand.u32 2147483647, %v531_v40 }
 0x3e3   : > { %v534_v44 = vsub.f32 1.0, %v533_v42  ;;  %895 = vlog2.f32 %v531_v40  ;;  %v892_v55 = vpop.eup %891  ;;  %v627_v62 = vmul.f32 0.6931472, %v890_v43  ;;  %vm552_vm2 = vweird.f32 %v531_v40 }
 0x3e4   : > { %v616_v59 = vmul.f32 %v613_v45, %v1139_v4  ;;  %v607_v9 = vmul.f32 0.6931472, %v892_v55  ;;  %v559_v30 = vor.u32 1.1754944e-38, %v558_v18  ;;  %vm557_vm4 = vcmp.eq.f32.partialorder %v556_v23, 8.507059e+37 }
 0x3e5   : > { %v535_v56 = vmul.f32 %v886_v39, %v534_v44  ;;  %v629_v15 = vmul.f32 %v627_v62, %v1145_v7 }
 0x3e6   : > { %v618_v60 = vsub.f32 %v530_v28, %v616_v59  ;;  %v609_v19 = vmul.f32 %v607_v9, %v1137_v3 }
 0x3e7   : > { %v536_v63 = vadd.f32 %v886_v39, %v535_v56  ;;  %v631_v27 = vsub.f32 %v1287_v0, %v629_v15 }
 0x3e8   : > { %v894_v8 = vpop.eup %893  ;;  %v620_v14 = vmul.f32 0.5, %v618_v60  ;;  %v611_v36 = vsub.f32 %v1321_v29, %v609_v19 }
 0x3e9   : > { %v896_v11 = vpop.eup %895  ;;  %v540_v12 = vsel %vm539_vm14, %v886_v39, %v536_v63  ;;  %v548_v13 = vmul.f32 %v894_v8, %v531_v40  ;;  %vm553_vm0 = vweird.f32 %v894_v8  ;;  %v633_v42 = vmul.f32 0.5, %v631_v27 }
 0x3ea   : > { %v545_v57 = vsel %vm542_vm15, %v544_v35, %v540_v12  ;;  %v615_v61 = vmul.f32 0.6931472, %v896_v11  ;;  %v622_v25 = vadd.f32 %v620_v14, %v610_v20  ;;  %vm554_vm3 = vmor %vm552_vm2, %vm553_vm0 }
 0x3eb   : > { %v546_v35 = vmul.f32 %v545_v57, %v1139_v4   ;;  %v549_v16 = vsub.f32 1.0, %v548_v13 }
 0x3ec   : > { %v617_v21 = vmul.f32 %v615_v61, %v1141_v5  ;;  %v634_v43 = vadd.f32 %v632_v32, %v622_v25 }
 0x3ed   : > { %v550_v22 = vmul.f32 %v894_v8, %v549_v16 }
 0x3ee   : > { %v619_v24 = vsub.f32 %v531_v40, %v617_v21  ;;  %v636_v0 = vsel %vm88_vm1, %v634_v43, 0.0 }
 0x3ef   : > { %v551_v28 = vadd.f32 %v894_v8, %v550_v22 }
 0x3f0   : > { %v621_v31 = vmul.f32 0.5, %v619_v24 }
 0x3f1   : > { %v555_v39 = vsel %vm554_vm3, %v894_v8, %v551_v28 }
 0x3f2   : > { %v560_v26 = vsel %vm557_vm4, %v559_v30, %v555_v39  ;;  %v623_v41 = vadd.f32 %v621_v31, %v611_v36 }
 0x3f3   : > { %v561_v36 = vmul.f32 %v560_v26, %v1141_v5  }
 0x3f4   : > { %v635_v44 = vadd.f32 %v633_v42, %v623_v41 }
 0x3f6   : > { %v637_v40 = vsel %vm88_vm1, %v635_v44, 0.0 }
 0x3f7   : > { %v638_v45 = vadd.f32 %v637_v40, %v636_v0 }
 0x3f9   : > { %639 = vadd.xlane.f32.xlu2 %v638_v45 }
 0x46c   : > { %v640_v46 = vpop.xlane.xlu2 %639 }
 0x46d   : > { %v641_v29 = vrot.slane %v640_v46, 4 }
 0x46f   : > { %v642_v47 = vadd.f32 %v641_v29, %v640_v46 }
 0x471   : > { %v643_v48 = vrot.slane %v642_v47, 2 }
 0x473   : > { %v644_v55 = vadd.f32 %v643_v48, %v642_v47 }
 0x475   : > { %v645_v56 = vrot.slane %v644_v55, 1 }
 0x477   : > { %v646_v58 = vadd.f32 %v645_v56, %v644_v55 }
 0x479   : > { %731 = vpush %v646_v58 }
 0x4aa   : > { %s732_s2 = spop %731  }
 0x4ab   : > { %s648_s28 = ssub.f32 %s1093_s0, %s732_s2  }
 0x4ad   : > { %p129_p1 = scmp.gt.f32.partialorder %s648_s28, 0.0  ;;  %s1413_s0 = smov %s648_s28 }
 0x4af   :  { %132 = sbr.rel (%p129_p1) target bundleno = 215 (0xd7), region = 52 }
 0x4b4 PF:  { %650 = sst [smem:[#allocation8]] %s1097_s2  ;;  %s656_s4 = sshll.u32 %s1412_s3, 4  ;;  %s1097_s2 = sphi %s1161_s2, %s732_s2   ;;  %s657_s4 = int_to_ptr.hbm [resolvable:$true] %s656_s4 }
 0x4b5   :  { %s1105_s5 = smov [#allocation8]  }
 0x4b6   :  { %659 = dma.smem_to_hbm %s1105_s5, 16, %s657_s4, [#allocation4]  }
 0x4b7   :  { %1041 = dma.done.wait [#allocation4], 16  }
 0x4b8   :  { %1042 = vsyncadd [#allocation4], 4294967280 }
 0x4b9   :  { %664 = sfence }
 0x4ba   :  { %665 = vsyncpa [#allocation3], 1 }
 0x4bb   :  { %666 = vsyncpa [#allocation6], 1 }
 0x4bc   :  { %667 = vsyncpa [#allocation4], 1 }

</bundles_post_ra>
